<compile_context>
chip_gen: v7x
topology: tpu7x:2x2x1
jax: 0.10.0
libtpu: 0.0.40
codegen_flags: <defaults>
</compile_context>

<pallas_src>
import numpy as np
import jax
import jax.numpy as jnp
from jax.experimental import pallas as pl
from jax.experimental.pallas import tpu as pltpu

# ---- model dims (stand-ins for config.model_params) ----
ACOUSTIC_IN  = 32   # acoustic_input_dim
ACOUSTIC_HID = 64   # acoustic_hidden_dim
ACOUSTIC_ENC = 32   # acoustic_encoding_dim
BERT_HID     = 64   # bert_hidden_dim
SEM_ENC      = 32   # semantic_encoding_dim
TIMING_IN    = 4    # timing_input_dim  (ends, tlen, intervals, speaking_rate)
TIMING_ENC   = 16   # timing_encoding_dim
ENC_DIM      = 32   # encoding_dim
ALPHA        = 2.0  # config.loss_params.loss_weight

CAT          = ACOUSTIC_ENC + SEM_ENC + TIMING_ENC            # 80
HEAD_BIAS    = SEM_ENC + TIMING_ENC + CAT + ENC_DIM           # 160

ACOUSTIC_ROW_TILE = 256   # multiple of 256 -> fills v6e/v7x 256-wide MXU on M
HEAD_ROW_TILE     = 256
VMEM_LIMIT        = 32 * 1024 * 1024   # explicit; safe on v5e/v6e/v7x


def _round_up(n, m):
    return ((n + m - 1) // m) * m


# ----------------------------------------------------------------------------
# Pallas kernel 1: acoustic encoder (per-frame 2-layer MLP)
# ----------------------------------------------------------------------------
def acoustic_kernel(x_ref, w1_ref, b1_ref, w2_ref, b2_ref, o_ref):
    # relu(x @ W1 + b1) @ W2 + b2 ; bf16 operands, f32 accumulation
    h = jnp.dot(x_ref[...], w1_ref[...],
                preferred_element_type=jnp.float32) + b1_ref[...]
    h = jnp.maximum(h, 0.0)
    y = jnp.dot(h.astype(jnp.bfloat16), w2_ref[...],
                preferred_element_type=jnp.float32) + b2_ref[...]
    o_ref[...] = y.astype(o_ref.dtype)


def acoustic_encoder(feats_2d, p, row_tile=ACOUSTIC_ROW_TILE):
    # TODO(synk): the reference AcousticEncoder is a packed-sequence recurrent
    # encoder; approximated here by a per-frame MLP (the matmul hot path).
    R, D = feats_2d.shape
    Rpad = _round_up(R, row_tile)
    x = feats_2d.astype(jnp.bfloat16)
    if Rpad != R:
        x = jnp.pad(x, ((0, Rpad - R), (0, 0)))
    out = pl.pallas_call(
        acoustic_kernel,
        out_shape=jax.ShapeDtypeStruct((Rpad, ACOUSTIC_ENC), jnp.bfloat16),
        grid=(Rpad // row_tile,),
        in_specs=[
            pl.BlockSpec((row_tile, D),                 lambda i: (i, 0)),
            pl.BlockSpec((D, ACOUSTIC_HID),             lambda i: (0, 0)),
            pl.BlockSpec((1, ACOUSTIC_HID),             lambda i: (0, 0)),
            pl.BlockSpec((ACOUSTIC_HID, ACOUSTIC_ENC),  lambda i: (0, 0)),
            pl.BlockSpec((1, ACOUSTIC_ENC),             lambda i: (0, 0)),
        ],
        out_specs=pl.BlockSpec((row_tile, ACOUSTIC_ENC), lambda i: (i, 0)),
        compiler_params=pltpu.CompilerParams(
            dimension_semantics=("parallel",),
            vmem_limit_bytes=VMEM_LIMIT),
    )(x, p["ac_w1_bf16"], p["ac_b1"], p["ac_w2_bf16"], p["ac_b2"])
    return out[:R]


# ----------------------------------------------------------------------------
# Pallas kernel 2: semantic + timing encoders + gated fusion (up to hidden h)
# ----------------------------------------------------------------------------
def fused_head_kernel(ra_ref, bert_ref, ft_ref,
                      ws_ref, wt_ref, wg_ref, wf_ref, bias_ref,
                      h_ref):
    bias = bias_ref[...]                                  # (1, 160) packed
    bs = bias[:, 0:SEM_ENC]
    bt = bias[:, SEM_ENC:SEM_ENC + TIMING_ENC]
    bg = bias[:, SEM_ENC + TIMING_ENC:SEM_ENC + TIMING_ENC + CAT]
    bf = bias[:, SEM_ENC + TIMING_ENC + CAT:HEAD_BIAS]

    r_a = ra_ref[...].astype(jnp.float32)
    # semantic encoder: projection of (pre-computed) BERT embeddings
    r_s = jnp.maximum(
        jnp.dot(bert_ref[...], ws_ref[...],
                preferred_element_type=jnp.float32) + bs, 0.0)
    # timing encoder
    r_t = jnp.maximum(
        jnp.dot(ft_ref[...], wt_ref[...],
                preferred_element_type=jnp.float32) + bt, 0.0)

    # gated fusion: one packed gate matmul, elementwise gating (no 2nd concat)
    r = jnp.concatenate([r_a, r_s, r_t], axis=-1)         # (tile, 80)
    gates = jax.nn.sigmoid(
        jnp.dot(r, wg_ref[...], preferred_element_type=jnp.float32) + bg)
    fused = gates * r                                     # same column order
    h = jnp.maximum(
        jnp.dot(fused, wf_ref[...], preferred_element_type=jnp.float32) + bf,
        0.0)
    h_ref[...] = h


def gated_fusion_head(ra, bert, ft, p, row_tile=HEAD_ROW_TILE):
    N = ra.shape[0]
    Npad = _round_up(max(N, 1), row_tile)
    pad = Npad - N
    ra_p   = jnp.pad(ra,   ((0, pad), (0, 0)))
    bert_p = jnp.pad(bert, ((0, pad), (0, 0)))
    ft_p   = jnp.pad(ft,   ((0, pad), (0, 0)))

    h = pl.pallas_call(
        fused_head_kernel,
        out_shape=jax.ShapeDtypeStruct((Npad, ENC_DIM), jnp.float32),
        grid=(Npad // row_tile,),
        in_specs=[
            pl.BlockSpec((row_tile, ACOUSTIC_ENC), lambda i: (i, 0)),
            pl.BlockSpec((row_tile, BERT_HID),     lambda i: (i, 0)),
            pl.BlockSpec((row_tile, TIMING_IN),    lambda i: (i, 0)),
            pl.BlockSpec((BERT_HID, SEM_ENC),      lambda i: (0, 0)),
            pl.BlockSpec((TIMING_IN, TIMING_ENC),  lambda i: (0, 0)),
            pl.BlockSpec((CAT, CAT),               lambda i: (0, 0)),
            pl.BlockSpec((CAT, ENC_DIM),           lambda i: (0, 0)),
            pl.BlockSpec((1, HEAD_BIAS),           lambda i: (0, 0)),
        ],
        out_specs=pl.BlockSpec((row_tile, ENC_DIM), lambda i: (i, 0)),
        compiler_params=pltpu.CompilerParams(
            dimension_semantics=("parallel",),
            vmem_limit_bytes=VMEM_LIMIT),
    )(ra_p, bert_p, ft_p,
      p["sem_w"], p["tim_w"], p["gate_w"], p["fuse_w"], p["head_b"])
    return h[:N]


# ----------------------------------------------------------------------------
# deterministic parameter init (PyTorch-like uniform(+-1/sqrt(fan_in)))
# ----------------------------------------------------------------------------
def _linear(key, fan_in, fan_out):
    kw, kb = jax.random.split(key)
    bound = 1.0 / float(np.sqrt(fan_in))
    w = jax.random.uniform(kw, (fan_in, fan_out), jnp.float32, -bound, bound)
    b = jax.random.uniform(kb, (1, fan_out), jnp.float32, -bound, bound)
    return w, b


def init_params(key):
    ks = jax.random.split(key, 9)
    p = {}
    p["ac_w1"], p["ac_b1"] = _linear(ks[0], ACOUSTIC_IN, ACOUSTIC_HID)
    p["ac_w2"], p["ac_b2"] = _linear(ks[1], ACOUSTIC_HID, ACOUSTIC_ENC)
    p["sem_w"], p["sem_b"] = _linear(ks[2], BERT_HID, SEM_ENC)
    p["tim_w"], p["tim_b"] = _linear(ks[3], TIMING_IN, TIMING_ENC)
    p["ga_w"], p["ga_b"] = _linear(ks[4], CAT, ACOUSTIC_ENC)
    p["gs_w"], p["gs_b"] = _linear(ks[5], CAT, SEM_ENC)
    p["gt_w"], p["gt_b"] = _linear(ks[6], CAT, TIMING_ENC)
    p["fuse_w"], p["fuse_b"] = _linear(ks[7], CAT, ENC_DIM)
    p["out_w"], p["out_b"] = _linear(ks[8], ENC_DIM, 2)

    # ---- host-side pre-packing for the kernels ----
    p["ac_w1_bf16"] = p["ac_w1"].astype(jnp.bfloat16)
    p["ac_w2_bf16"] = p["ac_w2"].astype(jnp.bfloat16)
    # gate weights packed to a single (80, 80) matmul, columns in [a|s|t] order
    p["gate_w"] = jnp.concatenate([p["ga_w"], p["gs_w"], p["gt_w"]], axis=1)
    # all head biases packed into one (1, 160) ref: [sem | tim | gates | fuse]
    p["head_b"] = jnp.concatenate(
        [p["sem_b"], p["tim_b"], p["ga_b"], p["gs_b"], p["gt_b"], p["fuse_b"]],
        axis=1)
    return p


# ----------------------------------------------------------------------------
# GMFModel.forward — host-side glue reproduces the original numpy/python loop,
# all dense compute runs in the Pallas kernels above (final 2-class projection,
# softmax and weighted-CE reduction stay in XLA to avoid 2-wide masked stores).
# ----------------------------------------------------------------------------
def gmf_forward(batch, params, split="train"):
    chs, texts = batch["chs"], batch["texts"]
    vads, targets = batch["vads"], batch["targets"]
    feats = batch["feats"]
    input_lengths, offsets = batch["input_lengths"], batch["offsets"]
    B, T, _ = feats.shape

    # acoustic encoder over all padded frames (Pallas kernel #1)
    ra_flat = acoustic_encoder(feats.reshape(B * T, ACOUSTIC_IN), params)

    # --- data-dependent end-frame selection (host side, as in the reference) ---
    flat_idx_list, targets_list, text_list = [], [], []
    ends_list, intervals_list = [], []
    for i in range(len(chs)):
        L = int(input_lengths[i])
        tgt = np.asarray(targets[i][:L])
        vad = np.asarray(vads[i][:L])
        res_timing = tgt[:-1] - tgt[1:]
        neg = np.where(res_timing == -1)[0]
        # reference indexes [0] unguarded (IndexError if no 0->1 transition)
        timing = (int(neg[0]) + 1) if neg.size > 0 else L
        res = vad[:-1] - vad[1:]
        ends = np.where(res == 1)[0] + 1
        if len(ends) > 0:
            ends = ends[ends <= 5 + timing - offsets[i] // 50 + 1]
        elif offsets[i] <= 0:
            ends = np.array([L - 1])
        if len(ends) == 0:
            ends = np.array([L - 1])
            ends_ = np.array([L - 1])
        else:
            ends_ = ends.copy()
            for j in range(len(ends)):
                if ends[j] + 4 < L:
                    ends_[j] = ends[j] + 4
        tmp = tgt[ends].copy()
        tmp[:-1] = 0
        tmp[-1] = 1
        flat_idx_list.append(i * T + np.asarray(ends, dtype=np.int32))
        targets_list.append(tmp)
        text_list += np.array(texts[i])[ends_].tolist()
        ends_list += ends.tolist()
        intervals_list += [0] + list(ends[1:] - ends[:-1])

    # single batched gather of the selected acoustic frames (one device op)
    flat_idx = np.concatenate(flat_idx_list).astype(np.int32)
    r_a = jnp.take(ra_flat, jnp.asarray(flat_idx), axis=0)      # (N, 32) bf16

    targets_np = np.concatenate(targets_list).astype(np.int32)
    N = int(targets_np.shape[0])

    tlen = [len(t) for t in text_list]
    tl_pre, end_pre = 0, 0
    speaking_rates = []
    for i in range(len(tlen)):
        # NOTE: reproduces the original operator precedence exactly
        speaking_rates.append((tlen[i] - tl_pre) / ends_list[i] - end_pre)
        tl_pre = tlen[i]
        end_pre = ends_list[i]
    feat_t = np.array([ends_list, tlen, intervals_list, speaking_rates],
                      dtype=np.float32).T                        # [N, 4]

    # TODO(synk): SemanticEncoder wraps a BERT text encoder; replaced here with
    # deterministic synthetic sentence embeddings of the same shape.
    bert_emb = jax.random.normal(jax.random.PRNGKey(42), (N, BERT_HID),
                                 jnp.float32)

    # semantic + timing encoders + gated fusion (Pallas kernel #2)
    h = gated_fusion_head(r_a, bert_emb, jnp.asarray(feat_t), params)

    # final 2-class projection + softmax + loss in XLA (lane-sparse 32->2 work)
    logits = h @ params["out_w"] + params["out_b"]               # (N, 2)
    logp = jax.nn.log_softmax(logits, axis=-1)
    probs = jnp.exp(logp)

    # TODO(synk): exact gfblock.get_loss unknown; weighted cross-entropy with
    # class weights [1.0, alpha] assumed (matches self.weights in __init__).
    targets_ = jnp.asarray(targets_np)
    class_w = jnp.array([1.0, ALPHA], jnp.float32)
    w = class_w[targets_]
    nll = -logp[jnp.arange(N), targets_]
    loss = jnp.sum(w * nll) / jnp.sum(w)
    correct = int(jnp.sum(jnp.argmax(probs, axis=1) == targets_))
    total = N
    outputs = {f"{split}_loss": loss,
               f"{split}_correct": correct,
               f"{split}_total": total}
    return outputs, probs


# ----------------------------------------------------------------------------
if __name__ == "__main__":
    key = jax.random.PRNGKey(0)
    kp, kf = jax.random.split(key)
    params = init_params(kp)

    B, T = 2, 16
    feats = jax.random.normal(kf, (B, T, ACOUSTIC_IN), jnp.float32)

    targets = np.zeros((B, T), dtype=np.int64)
    targets[0, 10:] = 1
    targets[1, 8:] = 1
    vads = np.zeros((B, T), dtype=np.int64)
    vads[0] = [1, 1, 1, 0, 0, 1, 1, 1, 0, 0, 1, 1, 1, 1, 1, 1]
    vads[1] = [1, 1, 0, 0, 1, 1, 1, 0, 1, 1, 1, 1, 0, 0, 0, 0]
    input_lengths = [16, 12]
    offsets = [100, -50]
    texts = [["tok" * (1 + (i + j) % 3) for j in range(T)] for i in range(B)]
    chs = [0, 1]

    batch = dict(chs=chs, texts=texts, vads=vads, targets=targets,
                 feats=feats, input_lengths=input_lengths, offsets=offsets)

    outputs, probs = gmf_forward(batch, params, split="train")
    jax.block_until_ready(probs)
    jax.block_until_ready(outputs["train_loss"])
    print("KERNEL_OK")
</pallas_src>

<mosaic_0001>
module attributes {stable_mosaic.version = 11 : i64} {
  func.func @acoustic_kernel(%arg0: i32, %arg1: memref<256x32xbf16, #tpu.memory_space<vmem>>, %arg2: memref<32x64xbf16, #tpu.memory_space<vmem>>, %arg3: memref<1x64xf32, #tpu.memory_space<vmem>>, %arg4: memref<64x32xbf16, #tpu.memory_space<vmem>>, %arg5: memref<1x32xf32, #tpu.memory_space<vmem>>, %arg6: memref<256x32xbf16, #tpu.memory_space<vmem>>) attributes {dimension_semantics = [#tpu.dimension_semantics<parallel>], iteration_bounds = array<i64: 1>, scalar_prefetch = 0 : i64, scratch_operands = 0 : i64, tpu.core_type = #tpu.core_type<tc>, window_params = [{transform_indices = @transform_0, window_bounds = array<i64: 256, 32>}, {pipeline_mode = #tpu.pipeline_mode<synchronous>, transform_indices = @transform_1, window_bounds = array<i64: 32, 64>}, {pipeline_mode = #tpu.pipeline_mode<synchronous>, transform_indices = @transform_2, window_bounds = array<i64: 1, 64>}, {pipeline_mode = #tpu.pipeline_mode<synchronous>, transform_indices = @transform_3, window_bounds = array<i64: 64, 32>}, {pipeline_mode = #tpu.pipeline_mode<synchronous>, transform_indices = @transform_4, window_bounds = array<i64: 1, 32>}, {transform_indices = @transform_5, window_bounds = array<i64: 256, 32>}]} {
    %c0 = arith.constant 0 : index
    %c0_0 = arith.constant 0 : index
    %0 = vector.load %arg1[%c0, %c0_0] : memref<256x32xbf16, #tpu.memory_space<vmem>>, vector<256x32xbf16>
    %c0_1 = arith.constant 0 : index
    %c0_2 = arith.constant 0 : index
    %1 = vector.load %arg2[%c0_1, %c0_2] : memref<32x64xbf16, #tpu.memory_space<vmem>>, vector<32x64xbf16>
    %cst = arith.constant dense<0.000000e+00> : vector<256x64xf32>
    %2 = tpu.matmul %0, %1, %cst {dimension_numbers = #tpu.dot_dimension_numbers<[1], [0], [0], [1], [0, 0, 1, 1], [], []>} : vector<256x32xbf16>, vector<32x64xbf16>, vector<256x64xf32> -> vector<256x64xf32>
    %c0_3 = arith.constant 0 : index
    %c0_4 = arith.constant 0 : index
    %3 = vector.load %arg3[%c0_3, %c0_4] : memref<1x64xf32, #tpu.memory_space<vmem>>, vector<1x64xf32>
    %4 = vector.broadcast %3 : vector<1x64xf32> to vector<256x64xf32>
    %5 = arith.addf %2, %4 : vector<256x64xf32>
    %cst_5 = arith.constant 0.000000e+00 : f32
    %6 = vector.broadcast %cst_5 : f32 to vector<256x64xf32>
    %7 = arith.maximumf %5, %6 : vector<256x64xf32>
    %8 = arith.truncf %7 : vector<256x64xf32> to vector<256x64xbf16>
    %c0_6 = arith.constant 0 : index
    %c0_7 = arith.constant 0 : index
    %9 = vector.load %arg4[%c0_6, %c0_7] : memref<64x32xbf16, #tpu.memory_space<vmem>>, vector<64x32xbf16>
    %cst_8 = arith.constant dense<0.000000e+00> : vector<256x32xf32>
    %10 = tpu.matmul %8, %9, %cst_8 {dimension_numbers = #tpu.dot_dimension_numbers<[1], [0], [0], [1], [0, 0, 1, 1], [], []>} : vector<256x64xbf16>, vector<64x32xbf16>, vector<256x32xf32> -> vector<256x32xf32>
    %c0_9 = arith.constant 0 : index
    %c0_10 = arith.constant 0 : index
    %11 = vector.load %arg5[%c0_9, %c0_10] : memref<1x32xf32, #tpu.memory_space<vmem>>, vector<1x32xf32>
    %12 = vector.broadcast %11 : vector<1x32xf32> to vector<256x32xf32>
    %13 = arith.addf %10, %12 : vector<256x32xf32>
    %14 = arith.truncf %13 : vector<256x32xf32> to vector<256x32xbf16>
    %c0_11 = arith.constant 0 : index
    %c0_12 = arith.constant 0 : index
    %15 = vector.load %arg6[%c0_11, %c0_12] : memref<256x32xbf16, #tpu.memory_space<vmem>>, vector<256x32xbf16>
    tpu.vector_store %arg6[%c0_11, %c0_12], %14 {strides = array<i32>} : memref<256x32xbf16, #tpu.memory_space<vmem>>, vector<256x32xbf16>,
    return
  }
  func.func @transform_0(%arg0: i32) -> (i32, i32) {
    %c0_i32 = arith.constant 0 : i32
    %c0_i32_0 = arith.constant 0 : i32
    return %arg0, %c0_i32 : i32, i32
  }
  func.func @transform_1(%arg0: i32) -> (i32, i32) {
    %c0_i32 = arith.constant 0 : i32
    %c0_i32_0 = arith.constant 0 : i32
    %c0_i32_1 = arith.constant 0 : i32
    return %c0_i32, %c0_i32_0 : i32, i32
  }
  func.func @transform_2(%arg0: i32) -> (i32, i32) {
    %c0_i32 = arith.constant 0 : i32
    %c0_i32_0 = arith.constant 0 : i32
    %c0_i32_1 = arith.constant 0 : i32
    return %c0_i32, %c0_i32_0 : i32, i32
  }
  func.func @transform_3(%arg0: i32) -> (i32, i32) {
    %c0_i32 = arith.constant 0 : i32
    %c0_i32_0 = arith.constant 0 : i32
    %c0_i32_1 = arith.constant 0 : i32
    return %c0_i32, %c0_i32_0 : i32, i32
  }
  func.func @transform_4(%arg0: i32) -> (i32, i32) {
    %c0_i32 = arith.constant 0 : i32
    %c0_i32_0 = arith.constant 0 : i32
    %c0_i32_1 = arith.constant 0 : i32
    return %c0_i32, %c0_i32_0 : i32, i32
  }
  func.func @transform_5(%arg0: i32) -> (i32, i32) {
    %c0_i32 = arith.constant 0 : i32
    %c0_i32_0 = arith.constant 0 : i32
    return %arg0, %c0_i32 : i32, i32
  }
}

</mosaic_0001>

<bundles_post_ra>
// kernel: tpu_custom_call.1
= control target key start
LH: loop header
LB: loop body
LE: loop exit
PB: predicated region body
PF: predicated region fallthrough
CT: control target
= control target key end

     0   :  { %vm156_vm0 = vcmask 261120   ;;  %vm453_vm1 = vcmask 523264   ;;  %vm791_vm2 = vcmask 257024   ;;  %s1414_s1 = inlined_call_operand.vmem [shape: bf16[32,64], index: 1, kind: input, shape index: {}]   ;;  %s1415_s0 = inlined_call_operand.vmem [shape: bf16[256,32], index: 0, kind: input, shape index: {}]   ;;  %s1416_s3 = inlined_call_operand.vmem [shape: bf16[64,32], index: 3, kind: input, shape index: {}]   ;;  %s1417_s2 = inlined_call_operand.vmem [shape: f32[1,64], index: 2, kind: input, shape index: {}]   ;;  %s1418_s4 = inlined_call_operand.vmem [shape: f32[1,32], index: 4, kind: input, shape index: {}]   ;;  %s1419_s5 = inlined_call_operand.vmem [shape: bf16[256,32], index: 5, kind: output, shape index: {}]  }
   0x1   :  { %v1062_v0 = vld [vmem:[%s1414_s1] sm:$0xff]   ;;  %v1063_v1 = vld [vmem:[%s1414_s1 + $0x8] sm:$0xff]   ;;  %v1066_v4 = vld [vmem:[%s1415_s0 + $0x10] sm:$0xff]  }
   0x2   :  { %986 = vmatprep.subr.bf16.mxu0 %v1062_v0  ;;  %v1064_v2 = vld [vmem:[%s1415_s0] sm:$0xff]   ;;  %v1065_v3 = vld [vmem:[%s1415_s0 + $0x8] sm:$0xff]   ;;  %v1067_v5 = vld [vmem:[%s1415_s0 + $0x18] sm:$0xff]  }
   0x3   :  { %987 = vmatpush3.bf16.msra.mxu0 %v1062_v0  ;;  %990 = vmatprep.mubr.msk.bf16.mxu0 %vm156_vm0, %v1064_v2  ;;  %v1068_v6 = vld [vmem:[%s1415_s0 + $0x20] sm:$0xff]   ;;  %v1081_v8 = vld [vmem:[%s1416_s3 + $0x8] sm:$0xff]   ;;  %v1070_v10 = vld [vmem:[%s1415_s0 + $0x30] sm:$0xff]  }
   0x4   :  { %988 = vmatprep.subr.bf16.mxu0 %v1063_v1  ;;  %v1080_v7 = vld [vmem:[%s1416_s3] sm:$0xff]   ;;  %v1069_v9 = vld [vmem:[%s1415_s0 + $0x28] sm:$0xff]   ;;  %v1071_v11 = vld [vmem:[%s1415_s0 + $0x38] sm:$0xff]  }
   0x5   :  { %1022 = vmatprep.subr.bf16.mxu1 %v1080_v7  ;;  %v1072_v12 = vld [vmem:[%s1415_s0 + $0x40] sm:$0xff]   ;;  %v1073_v13 = vld [vmem:[%s1415_s0 + $0x48] sm:$0xff]   ;;  %v1074_v14 = vld [vmem:[%s1415_s0 + $0x50] sm:$0xff]  }
   0x6   :  { %1023 = vmatpush3.bf16.msra.mxu1 %v1080_v7  ;;  %v1075_v15 = vld [vmem:[%s1415_s0 + $0x58] sm:$0xff]   ;;  %v1076_v16 = vld [vmem:[%s1415_s0 + $0x60] sm:$0xff]   ;;  %v1077_v17 = vld [vmem:[%s1415_s0 + $0x68] sm:$0xff]  }
   0x7   :  { %989 = vmatpush3.bf16.msra.mxu0 %v1063_v1  ;;  %1024 = vmatprep.subr.bf16.mxu1 %v1081_v8  ;;  %v1078_v18 = vld [vmem:[%s1415_s0 + $0x70] sm:$0xff]   ;;  %v1079_v19 = vld [vmem:[%s1415_s0 + $0x78] sm:$0xff]   ;;  %v1199_v22 = vld [vmem:[%s1417_s2] ss:$0 sm:$0xff] }
   0x8   :  { %v1082_v20 = vld [vmem:[%s1416_s3 + $0x10] sm:$0xff]   ;;  %v1083_v21 = vld [vmem:[%s1416_s3 + $0x18] sm:$0xff]  }
   0xa   :  { %991 = vmatmul.mubr.msk.bf16.vlgmr.msra.gmra.mrb[0].mxu0 %vm156_vm0, %v1065_v3  ;;  %1025 = vmatpush3.bf16.msra.mxu1 %v1081_v8 }
   0xb   :  { %994 = vmatprep.mubr.msk.bf16.mxu0 %vm156_vm0, %v1066_v4  ;;  %1026 = vmatprep.subr.bf16.mxu1 %v1082_v20 }
   0xe   :  { %1027 = vmatpush3.bf16.msra.mxu1 %v1082_v20 }
   0xf   :  { %1028 = vmatprep.subr.bf16.mxu1 %v1083_v21 }
  0x12   :  { %995 = vmatmul.mubr.msk.bf16.gmra.mrb[4].mxu0 %vm156_vm0, %v1067_v5  ;;  %1029 = vmatpush3.bf16.msra.mxu1 %v1083_v21 }
  0x13   :  { %998 = vmatprep.mubr.msk.bf16.mxu0 %vm156_vm0, %v1068_v6 }
  0x1a   :  { %999 = vmatmul.mubr.msk.bf16.gmra.mrb[8].mxu0 %vm156_vm0, %v1069_v9 }
  0x1b   :  { %1002 = vmatprep.mubr.msk.bf16.mxu0 %vm156_vm0, %v1070_v10 }
  0x22   :  { %1003 = vmatmul.mubr.msk.bf16.gmra.mrb[12].mxu0 %vm156_vm0, %v1071_v11 }
  0x23   :  { %1006 = vmatprep.mubr.msk.bf16.mxu0 %vm156_vm0, %v1072_v12 }
  0x2a   :  { %1007 = vmatmul.mubr.msk.bf16.gmra.mrb[16].mxu0 %vm156_vm0, %v1073_v13 }
  0x2b   :  { %1010 = vmatprep.mubr.msk.bf16.mxu0 %vm156_vm0, %v1074_v14 }
  0x32   :  { %1011 = vmatmul.mubr.msk.bf16.gmra.mrb[20].mxu0 %vm156_vm0, %v1075_v15 }
  0x33   :  { %1014 = vmatprep.mubr.msk.bf16.mxu0 %vm156_vm0, %v1076_v16 }
  0x3a   :  { %1015 = vmatmul.mubr.msk.bf16.gmra.mrb[24].mxu0 %vm156_vm0, %v1077_v17 }
  0x3b   :  { %1018 = vmatprep.mubr.msk.bf16.mxu0 %vm156_vm0, %v1078_v18 }
  0x42   :  { %1019 = vmatmul.mubr.msk.bf16.gmra.mrb[28].mxu0 %vm156_vm0, %v1079_v19 }
  0xdd   :  { %v992_v23 = vpop.f32.mrb[0].mxu0 }
  0xde   :  { %v248_v24 = vadd.f32 %v992_v23, %v1199_v22  ;;  %v239_v25 = vpop.f32.mrb[1].mxu0 }
  0xdf   :  { %v240_v26 = vadd.f32 %v1199_v22, %v239_v25  ;;  %v993_v27 = vpop.f32.mrb[2].mxu0 }
  0xe0   :  { %v251_v28 = vadd.f32 %v993_v27, %v1199_v22  ;;  %v242_v29 = vpop.f32.mrb[3].mxu0  ;;  %v368_v31 = vmax.f32 %v248_v24, 0.0 }
  0xe1   :  { %v243_v30 = vadd.f32 %v1199_v22, %v242_v29  ;;  %v366_v33 = vmax.f32 %v240_v26, 0.0 }
  0xe2   :  { %v369_v32 = vmax.f32 %v251_v28, 0.0 }
  0xe3   :  { %v367_v34 = vmax.f32 %v243_v30, 0.0 }
  0xe4   :  { %v399_v35 = vpack.c.bf16 %v369_v32, %v368_v31 }
  0xe5   :  { %v996_v36 = vpop.f32.mrb[4].mxu0  ;;  %v398_v37 = vpack.c.bf16 %v367_v34, %v366_v33 }
  0xe6   :  { %v264_v38 = vadd.f32 %v996_v36, %v1199_v22  ;;  %v255_v39 = vpop.f32.mrb[5].mxu0 }
  0xe7   :  { %v256_v40 = vadd.f32 %v1199_v22, %v255_v39  ;;  %v997_v41 = vpop.f32.mrb[6].mxu0  ;;  %1030 = vmatprep.mubr.msk.bf16.mxu1 %vm453_vm1, %v398_v37 }
  0xe8   :  { %v267_v42 = vadd.f32 %v997_v41, %v1199_v22  ;;  %v258_v43 = vpop.f32.mrb[7].mxu0  ;;  %1031 = vmatmul.mubr.msk.bf16.vlgmr.msra.gmra.mrb[0].mxu1 %vm453_vm1, %v399_v35  ;;  %v372_v45 = vmax.f32 %v264_v38, 0.0 }
  0xe9   :  { %v259_v44 = vadd.f32 %v1199_v22, %v258_v43  ;;  %v370_v47 = vmax.f32 %v256_v40, 0.0 }
  0xea   :  { %v373_v46 = vmax.f32 %v267_v42, 0.0 }
  0xeb   :  { %v371_v48 = vmax.f32 %v259_v44, 0.0 }
  0xec   :  { %v401_v49 = vpack.c.bf16 %v373_v46, %v372_v45 }
  0xed   :  { %v400_v50 = vpack.c.bf16 %v371_v48, %v370_v47  ;;  %v1000_v51 = vpop.f32.mrb[8].mxu0 }
  0xee   :  { %v280_v52 = vadd.f32 %v1000_v51, %v1199_v22  ;;  %v271_v53 = vpop.f32.mrb[9].mxu0 }
  0xef   :  { %v272_v54 = vadd.f32 %v1199_v22, %v271_v53  ;;  %v1001_v55 = vpop.f32.mrb[10].mxu0  ;;  %1034 = vmatprep.mubr.msk.bf16.mxu1 %vm453_vm1, %v400_v50 }
  0xf0   :  { %v283_v56 = vadd.f32 %v1001_v55, %v1199_v22  ;;  %v274_v57 = vpop.f32.mrb[11].mxu0  ;;  %1035 = vmatmul.mubr.msk.bf16.gmra.mrb[4].mxu1 %vm453_vm1, %v401_v49  ;;  %v376_v59 = vmax.f32 %v280_v52, 0.0 }
  0xf1   :  { %v275_v58 = vadd.f32 %v1199_v22, %v274_v57  ;;  %v374_v61 = vmax.f32 %v272_v54, 0.0 }
  0xf2   :  { %v377_v60 = vmax.f32 %v283_v56, 0.0 }
  0xf3   :  { %v375_v62 = vmax.f32 %v275_v58, 0.0 }
  0xf4   :  { %v403_v63 = vpack.c.bf16 %v377_v60, %v376_v59 }
  0xf5   :  { %v402_v0 = vpack.c.bf16 %v375_v62, %v374_v61  ;;  %v1004_v1 = vpop.f32.mrb[12].mxu0 }
  0xf6   :  { %v296_v2 = vadd.f32 %v1004_v1, %v1199_v22  ;;  %v287_v3 = vpop.f32.mrb[13].mxu0 }
  0xf7   :  { %v288_v4 = vadd.f32 %v1199_v22, %v287_v3  ;;  %v1005_v5 = vpop.f32.mrb[14].mxu0  ;;  %1038 = vmatprep.mubr.msk.bf16.mxu1 %vm453_vm1, %v402_v0 }
  0xf8   :  { %v299_v6 = vadd.f32 %v1005_v5, %v1199_v22  ;;  %v290_v7 = vpop.f32.mrb[15].mxu0  ;;  %1039 = vmatmul.mubr.msk.bf16.gmra.mrb[8].mxu1 %vm453_vm1, %v403_v63  ;;  %v380_v9 = vmax.f32 %v296_v2, 0.0 }
  0xf9   :  { %v291_v8 = vadd.f32 %v1199_v22, %v290_v7  ;;  %v378_v11 = vmax.f32 %v288_v4, 0.0 }
  0xfa   :  { %v381_v10 = vmax.f32 %v299_v6, 0.0 }
  0xfb   :  { %v379_v12 = vmax.f32 %v291_v8, 0.0  ;;  %v1252_v8 = vld [vmem:[%s1418_s4] ss:$0 sm:$0xff] }
  0xfc   :  { %v405_v13 = vpack.c.bf16 %v381_v10, %v380_v9 }
  0xfd   :  { %v404_v14 = vpack.c.bf16 %v379_v12, %v378_v11  ;;  %v1008_v15 = vpop.f32.mrb[16].mxu0 }
  0xfe   :  { %v312_v16 = vadd.f32 %v1008_v15, %v1199_v22  ;;  %v303_v17 = vpop.f32.mrb[17].mxu0 }
  0xff   :  { %v304_v18 = vadd.f32 %v1199_v22, %v303_v17  ;;  %v1009_v19 = vpop.f32.mrb[18].mxu0  ;;  %1042 = vmatprep.mubr.msk.bf16.mxu1 %vm453_vm1, %v404_v14 }
 0x100   :  { %v315_v20 = vadd.f32 %v1009_v19, %v1199_v22  ;;  %v306_v21 = vpop.f32.mrb[19].mxu0  ;;  %1043 = vmatmul.mubr.msk.bf16.gmra.mrb[12].mxu1 %vm453_vm1, %v405_v13  ;;  %v384_v24 = vmax.f32 %v312_v16, 0.0 }
 0x101   :  { %v307_v23 = vadd.f32 %v1199_v22, %v306_v21  ;;  %v382_v26 = vmax.f32 %v304_v18, 0.0 }
 0x102   :  { %v385_v25 = vmax.f32 %v315_v20, 0.0 }
 0x103   :  { %v383_v27 = vmax.f32 %v307_v23, 0.0 }
 0x104   :  { %v407_v28 = vpack.c.bf16 %v385_v25, %v384_v24 }
 0x105   :  { %v406_v29 = vpack.c.bf16 %v383_v27, %v382_v26  ;;  %v1012_v30 = vpop.f32.mrb[20].mxu0 }
 0x106   :  { %v328_v31 = vadd.f32 %v1012_v30, %v1199_v22  ;;  %v319_v32 = vpop.f32.mrb[21].mxu0 }
 0x107   :  { %v320_v33 = vadd.f32 %v1199_v22, %v319_v32  ;;  %v1013_v34 = vpop.f32.mrb[22].mxu0  ;;  %1046 = vmatprep.mubr.msk.bf16.mxu1 %vm453_vm1, %v406_v29 }
 0x108   :  { %v331_v35 = vadd.f32 %v1013_v34, %v1199_v22  ;;  %v322_v36 = vpop.f32.mrb[23].mxu0  ;;  %1047 = vmatmul.mubr.msk.bf16.gmra.mrb[16].mxu1 %vm453_vm1, %v407_v28  ;;  %v388_v38 = vmax.f32 %v328_v31, 0.0 }
 0x109   :  { %v323_v37 = vadd.f32 %v1199_v22, %v322_v36  ;;  %v386_v40 = vmax.f32 %v320_v33, 0.0 }
 0x10a   :  { %v389_v39 = vmax.f32 %v331_v35, 0.0 }
 0x10b   :  { %v387_v41 = vmax.f32 %v323_v37, 0.0 }
 0x10c   :  { %v409_v42 = vpack.c.bf16 %v389_v39, %v388_v38 }
 0x10d   :  { %v408_v43 = vpack.c.bf16 %v387_v41, %v386_v40  ;;  %v1016_v44 = vpop.f32.mrb[24].mxu0 }
 0x10e   :  { %v344_v45 = vadd.f32 %v1016_v44, %v1199_v22  ;;  %v335_v46 = vpop.f32.mrb[25].mxu0 }
 0x10f   :  { %v336_v47 = vadd.f32 %v1199_v22, %v335_v46  ;;  %v1017_v48 = vpop.f32.mrb[26].mxu0  ;;  %1050 = vmatprep.mubr.msk.bf16.mxu1 %vm453_vm1, %v408_v43 }
 0x110   :  { %v347_v49 = vadd.f32 %v1017_v48, %v1199_v22  ;;  %v338_v50 = vpop.f32.mrb[27].mxu0  ;;  %1051 = vmatmul.mubr.msk.bf16.gmra.mrb[20].mxu1 %vm453_vm1, %v409_v42  ;;  %v392_v52 = vmax.f32 %v344_v45, 0.0 }
 0x111   :  { %v339_v51 = vadd.f32 %v1199_v22, %v338_v50  ;;  %v390_v54 = vmax.f32 %v336_v47, 0.0 }
 0x112   :  { %v393_v53 = vmax.f32 %v347_v49, 0.0 }
 0x113   :  { %v391_v55 = vmax.f32 %v339_v51, 0.0 }
 0x114   :  { %v411_v56 = vpack.c.bf16 %v393_v53, %v392_v52 }
 0x115   :  { %v410_v57 = vpack.c.bf16 %v391_v55, %v390_v54  ;;  %v1020_v58 = vpop.f32.mrb[28].mxu0 }
 0x116   :  { %v360_v59 = vadd.f32 %v1020_v58, %v1199_v22  ;;  %v351_v60 = vpop.f32.mrb[29].mxu0 }
 0x117   :  { %v352_v61 = vadd.f32 %v1199_v22, %v351_v60  ;;  %v1021_v62 = vpop.f32.mrb[30].mxu0  ;;  %1054 = vmatprep.mubr.msk.bf16.mxu1 %vm453_vm1, %v410_v57 }
 0x118   :  { %v363_v63 = vadd.f32 %v1021_v62, %v1199_v22  ;;  %v354_v0 = vpop.f32.mrb[31].mxu0  ;;  %1055 = vmatmul.mubr.msk.bf16.gmra.mrb[24].mxu1 %vm453_vm1, %v411_v56  ;;  %v396_v2 = vmax.f32 %v360_v59, 0.0 }
 0x119   :  { %v355_v1 = vadd.f32 %v1199_v22, %v354_v0  ;;  %v394_v4 = vmax.f32 %v352_v61, 0.0 }
 0x11a   :  { %v397_v3 = vmax.f32 %v363_v63, 0.0 }
 0x11b   :  { %v395_v5 = vmax.f32 %v355_v1, 0.0 }
 0x11c   :  { %v413_v6 = vpack.c.bf16 %v397_v3, %v396_v2 }
 0x11d   :  { %v412_v7 = vpack.c.bf16 %v395_v5, %v394_v4 }
 0x11f   :  { %1058 = vmatprep.mubr.msk.bf16.mxu1 %vm453_vm1, %v412_v7 }
 0x120   :  { %1059 = vmatmul.mubr.msk.bf16.gmra.mrb[28].mxu1 %vm453_vm1, %v413_v6 }
 0x1bb   :  { %v1032_v9 = vpop.f32.mrb[0].mxu1 }
 0x1bc   :  { %v545_v10 = vadd.f32 %v1032_v9, %v1252_v8  ;;  %v536_v11 = vpop.f32.mrb[1].mxu1 }
 0x1bd   :  { %v537_v22 = vadd.f32 %v1252_v8, %v536_v11  ;;  %v1033_v12 = vpop.f32.mrb[2].mxu1 }
 0x1be   :  { %v918_v13 = vpack.c.bf16 %v545_v10, %v545_v10  ;;  %v548_v14 = vadd.f32 %v1033_v12, %v1252_v8  ;;  %v539_v15 = vpop.f32.mrb[3].mxu1 }
 0x1bf   :  { %v916_v16 = vpack.c.bf16 %v537_v22, %v537_v22  ;;  %v540_v17 = vadd.f32 %v1252_v8, %v539_v15 }
 0x1c0   :  { %794 = vst.msk [vmem:[%s1419_s5 + $0x8] sm:$0xf] %vm791_vm2, %v918_v13  ;;  %v919_v18 = vpack.c.bf16 %v548_v14, %v548_v14 }
 0x1c1   :  { %792 = vst.msk [vmem:[%s1419_s5] sm:$0xf] %vm791_vm2, %v916_v16  ;;  %v917_v19 = vpack.c.bf16 %v540_v17, %v540_v17 }
 0x1c2   :  { %795 = vst.msk [vmem:[%s1419_s5 + $0xc] sm:$0xf] %vm791_vm2, %v919_v18 }
 0x1c3   :  { %793 = vst.msk [vmem:[%s1419_s5 + $0x4] sm:$0xf] %vm791_vm2, %v917_v19  ;;  %v1036_v20 = vpop.f32.mrb[4].mxu1 }
 0x1c4   :  { %v561_v21 = vadd.f32 %v1036_v20, %v1252_v8  ;;  %v552_v23 = vpop.f32.mrb[5].mxu1 }
 0x1c5   :  { %v553_v24 = vadd.f32 %v1252_v8, %v552_v23  ;;  %v1037_v25 = vpop.f32.mrb[6].mxu1 }
 0x1c6   :  { %v922_v26 = vpack.c.bf16 %v561_v21, %v561_v21  ;;  %v564_v27 = vadd.f32 %v1037_v25, %v1252_v8  ;;  %v555_v28 = vpop.f32.mrb[7].mxu1 }
 0x1c7   :  { %v920_v29 = vpack.c.bf16 %v553_v24, %v553_v24  ;;  %v556_v30 = vadd.f32 %v1252_v8, %v555_v28 }
 0x1c8   :  { %798 = vst.msk [vmem:[%s1419_s5 + $0x18] sm:$0xf] %vm791_vm2, %v922_v26  ;;  %v923_v31 = vpack.c.bf16 %v564_v27, %v564_v27 }
 0x1c9   :  { %796 = vst.msk [vmem:[%s1419_s5 + $0x10] sm:$0xf] %vm791_vm2, %v920_v29  ;;  %v921_v32 = vpack.c.bf16 %v556_v30, %v556_v30 }
 0x1ca   :  { %799 = vst.msk [vmem:[%s1419_s5 + $0x1c] sm:$0xf] %vm791_vm2, %v923_v31 }
 0x1cb   :  { %797 = vst.msk [vmem:[%s1419_s5 + $0x14] sm:$0xf] %vm791_vm2, %v921_v32  ;;  %v1040_v33 = vpop.f32.mrb[8].mxu1 }
 0x1cc   :  { %v577_v34 = vadd.f32 %v1040_v33, %v1252_v8  ;;  %v568_v35 = vpop.f32.mrb[9].mxu1 }
 0x1cd   :  { %v569_v36 = vadd.f32 %v1252_v8, %v568_v35  ;;  %v1041_v37 = vpop.f32.mrb[10].mxu1 }
 0x1ce   :  { %v926_v38 = vpack.c.bf16 %v577_v34, %v577_v34  ;;  %v580_v39 = vadd.f32 %v1041_v37, %v1252_v8  ;;  %v571_v40 = vpop.f32.mrb[11].mxu1 }
 0x1cf   :  { %v924_v41 = vpack.c.bf16 %v569_v36, %v569_v36  ;;  %v572_v42 = vadd.f32 %v1252_v8, %v571_v40 }
 0x1d0   :  { %802 = vst.msk [vmem:[%s1419_s5 + $0x28] sm:$0xf] %vm791_vm2, %v926_v38  ;;  %v927_v43 = vpack.c.bf16 %v580_v39, %v580_v39 }
 0x1d1   :  { %800 = vst.msk [vmem:[%s1419_s5 + $0x20] sm:$0xf] %vm791_vm2, %v924_v41  ;;  %v925_v44 = vpack.c.bf16 %v572_v42, %v572_v42 }
 0x1d2   :  { %803 = vst.msk [vmem:[%s1419_s5 + $0x2c] sm:$0xf] %vm791_vm2, %v927_v43 }
 0x1d3   :  { %801 = vst.msk [vmem:[%s1419_s5 + $0x24] sm:$0xf] %vm791_vm2, %v925_v44  ;;  %v1044_v45 = vpop.f32.mrb[12].mxu1 }
 0x1d4   :  { %v593_v46 = vadd.f32 %v1044_v45, %v1252_v8  ;;  %v584_v47 = vpop.f32.mrb[13].mxu1 }
 0x1d5   :  { %v585_v48 = vadd.f32 %v1252_v8, %v584_v47  ;;  %v1045_v49 = vpop.f32.mrb[14].mxu1 }
 0x1d6   :  { %v930_v50 = vpack.c.bf16 %v593_v46, %v593_v46  ;;  %v596_v51 = vadd.f32 %v1045_v49, %v1252_v8  ;;  %v587_v52 = vpop.f32.mrb[15].mxu1 }
 0x1d7   :  { %v928_v53 = vpack.c.bf16 %v585_v48, %v585_v48  ;;  %v588_v54 = vadd.f32 %v1252_v8, %v587_v52 }
 0x1d8   :  { %806 = vst.msk [vmem:[%s1419_s5 + $0x38] sm:$0xf] %vm791_vm2, %v930_v50  ;;  %v931_v55 = vpack.c.bf16 %v596_v51, %v596_v51 }
 0x1d9   :  { %804 = vst.msk [vmem:[%s1419_s5 + $0x30] sm:$0xf] %vm791_vm2, %v928_v53  ;;  %v929_v56 = vpack.c.bf16 %v588_v54, %v588_v54 }
 0x1da   :  { %807 = vst.msk [vmem:[%s1419_s5 + $0x3c] sm:$0xf] %vm791_vm2, %v931_v55 }
 0x1db   :  { %805 = vst.msk [vmem:[%s1419_s5 + $0x34] sm:$0xf] %vm791_vm2, %v929_v56  ;;  %v1048_v57 = vpop.f32.mrb[16].mxu1 }
 0x1dc   :  { %v609_v58 = vadd.f32 %v1048_v57, %v1252_v8  ;;  %v600_v59 = vpop.f32.mrb[17].mxu1 }
 0x1dd   :  { %v601_v60 = vadd.f32 %v1252_v8, %v600_v59  ;;  %v1049_v61 = vpop.f32.mrb[18].mxu1 }
 0x1de   :  { %v934_v62 = vpack.c.bf16 %v609_v58, %v609_v58  ;;  %v612_v63 = vadd.f32 %v1049_v61, %v1252_v8  ;;  %v603_v0 = vpop.f32.mrb[19].mxu1 }
 0x1df   :  { %v932_v1 = vpack.c.bf16 %v601_v60, %v601_v60  ;;  %v604_v2 = vadd.f32 %v1252_v8, %v603_v0 }
 0x1e0   :  { %810 = vst.msk [vmem:[%s1419_s5 + $0x48] sm:$0xf] %vm791_vm2, %v934_v62  ;;  %v935_v3 = vpack.c.bf16 %v612_v63, %v612_v63 }
 0x1e1   :  { %808 = vst.msk [vmem:[%s1419_s5 + $0x40] sm:$0xf] %vm791_vm2, %v932_v1  ;;  %v933_v4 = vpack.c.bf16 %v604_v2, %v604_v2 }
 0x1e2   :  { %811 = vst.msk [vmem:[%s1419_s5 + $0x4c] sm:$0xf] %vm791_vm2, %v935_v3 }
 0x1e3   :  { %809 = vst.msk [vmem:[%s1419_s5 + $0x44] sm:$0xf] %vm791_vm2, %v933_v4  ;;  %v1052_v5 = vpop.f32.mrb[20].mxu1 }
 0x1e4   :  { %v625_v6 = vadd.f32 %v1052_v5, %v1252_v8  ;;  %v616_v7 = vpop.f32.mrb[21].mxu1 }
 0x1e5   :  { %v617_v9 = vadd.f32 %v1252_v8, %v616_v7  ;;  %v1053_v10 = vpop.f32.mrb[22].mxu1 }
 0x1e6   :  { %v938_v11 = vpack.c.bf16 %v625_v6, %v625_v6  ;;  %v628_v22 = vadd.f32 %v1053_v10, %v1252_v8  ;;  %v619_v12 = vpop.f32.mrb[23].mxu1 }
 0x1e7   :  { %v936_v13 = vpack.c.bf16 %v617_v9, %v617_v9  ;;  %v620_v14 = vadd.f32 %v1252_v8, %v619_v12 }
 0x1e8   :  { %814 = vst.msk [vmem:[%s1419_s5 + $0x58] sm:$0xf] %vm791_vm2, %v938_v11  ;;  %v939_v15 = vpack.c.bf16 %v628_v22, %v628_v22 }
 0x1e9   :  { %812 = vst.msk [vmem:[%s1419_s5 + $0x50] sm:$0xf] %vm791_vm2, %v936_v13  ;;  %v937_v16 = vpack.c.bf16 %v620_v14, %v620_v14 }
 0x1ea   :  { %815 = vst.msk [vmem:[%s1419_s5 + $0x5c] sm:$0xf] %vm791_vm2, %v939_v15 }
 0x1eb   :  { %813 = vst.msk [vmem:[%s1419_s5 + $0x54] sm:$0xf] %vm791_vm2, %v937_v16  ;;  %v1056_v17 = vpop.f32.mrb[24].mxu1 }
 0x1ec   :  { %v641_v18 = vadd.f32 %v1056_v17, %v1252_v8  ;;  %v632_v19 = vpop.f32.mrb[25].mxu1 }
 0x1ed   :  { %v633_v20 = vadd.f32 %v1252_v8, %v632_v19  ;;  %v1057_v21 = vpop.f32.mrb[26].mxu1 }
 0x1ee   :  { %v942_v23 = vpack.c.bf16 %v641_v18, %v641_v18  ;;  %v644_v24 = vadd.f32 %v1057_v21, %v1252_v8  ;;  %v635_v25 = vpop.f32.mrb[27].mxu1 }
 0x1ef   :  { %v940_v26 = vpack.c.bf16 %v633_v20, %v633_v20  ;;  %v636_v27 = vadd.f32 %v1252_v8, %v635_v25 }
 0x1f0   :  { %818 = vst.msk [vmem:[%s1419_s5 + $0x68] sm:$0xf] %vm791_vm2, %v942_v23  ;;  %v943_v28 = vpack.c.bf16 %v644_v24, %v644_v24 }
 0x1f1   :  { %816 = vst.msk [vmem:[%s1419_s5 + $0x60] sm:$0xf] %vm791_vm2, %v940_v26  ;;  %v941_v29 = vpack.c.bf16 %v636_v27, %v636_v27 }
 0x1f2   :  { %819 = vst.msk [vmem:[%s1419_s5 + $0x6c] sm:$0xf] %vm791_vm2, %v943_v28 }
 0x1f3   :  { %817 = vst.msk [vmem:[%s1419_s5 + $0x64] sm:$0xf] %vm791_vm2, %v941_v29  ;;  %v1060_v30 = vpop.f32.mrb[28].mxu1 }
 0x1f4   :  { %v657_v31 = vadd.f32 %v1060_v30, %v1252_v8  ;;  %v648_v32 = vpop.f32.mrb[29].mxu1 }
 0x1f5   :  { %v649_v33 = vadd.f32 %v1252_v8, %v648_v32  ;;  %v1061_v34 = vpop.f32.mrb[30].mxu1 }
 0x1f6   :  { %v946_v35 = vpack.c.bf16 %v657_v31, %v657_v31  ;;  %v660_v36 = vadd.f32 %v1061_v34, %v1252_v8  ;;  %v651_v37 = vpop.f32.mrb[31].mxu1 }
 0x1f7   :  { %v944_v38 = vpack.c.bf16 %v649_v33, %v649_v33  ;;  %v652_v39 = vadd.f32 %v1252_v8, %v651_v37 }
 0x1f8   :  { %822 = vst.msk [vmem:[%s1419_s5 + $0x78] sm:$0xf] %vm791_vm2, %v946_v35  ;;  %v947_v40 = vpack.c.bf16 %v660_v36, %v660_v36 }
 0x1f9   :  { %820 = vst.msk [vmem:[%s1419_s5 + $0x70] sm:$0xf] %vm791_vm2, %v944_v38  ;;  %v945_v41 = vpack.c.bf16 %v652_v39, %v652_v39 }
 0x1fa   :  { %823 = vst.msk [vmem:[%s1419_s5 + $0x7c] sm:$0xf] %vm791_vm2, %v947_v40 }
 0x1fb   :  { %821 = vst.msk [vmem:[%s1419_s5 + $0x74] sm:$0xf] %vm791_vm2, %v945_v41 }

</bundles_post_ra>
